<compile_context>
chip_gen: v7x
topology: tpu7x:2x2x1
jax: 0.10.0
libtpu: 0.0.40
codegen_flags: <defaults>
</compile_context>

<pallas_src>
import functools

import jax
import jax.numpy as jnp
import numpy as np
from jax import lax
from jax.experimental import pallas as pl
from jax.experimental.pallas import tpu as pltpu


def _st_nearest_kernel(lo_ref, hi_ref, x_ref, idx_ref, o_ref, acc_ref, *, TK):
    # lo_ref, hi_ref: (N*nj,) int32 in SMEM (scalar prefetch) — per-(n, j) chunk band.
    # x_ref : (nk, C, TK)  full (chunked) source image of this batch, VMEM resident.
    # idx_ref: (1, TJ)     int32 flat nearest-neighbour source index per output pixel.
    # o_ref : (C, TJ)      warped output tile.
    # acc_ref: (C, TJ)     f32 accumulator scratch.
    n = pl.program_id(0)
    j = pl.program_id(1)
    nj = pl.num_programs(1)
    t = n * nj + j
    lo = lo_ref[t]
    hi = hi_ref[t]

    idx = idx_ref[...]                                   # (1, TJ) int32
    q0 = lax.broadcasted_iota(jnp.int32, (TK, 1), 0)     # (TK, 1)

    def chunk(k):
        x_tile = x_ref[k]                                         # (C, TK), dynamic chunk
        onehot = ((q0 + k * TK) == idx).astype(x_tile.dtype)      # (TK, TJ) 0/1 selector
        return jnp.dot(x_tile, onehot, preferred_element_type=jnp.float32)

    # The band always contains at least one chunk, so seed with it (no zero-init pass).
    acc_ref[...] = chunk(lo)

    @pl.loop(lo + 1, hi)
    def _(k):
        acc_ref[...] += chunk(k)

    o_ref[...] = acc_ref[...].astype(o_ref.dtype)


def _round_up(v, m):
    return (v + m - 1) // m * m


def spatial_transform_nearest(x, flow, sample_grid, *, tile_j=1024, tile_k=256,
                              vmem_limit_bytes=48 * 1024 * 1024):
    """x: (N, C, H, W); flow, sample_grid: (N, H, W, 2) with last dim = (x, y).
    Returns (N, C, H, W) matching F.grid_sample(x, sample_grid + flow,
    mode='nearest', padding_mode='border', align_corners=True)."""
    N, C, H, W = x.shape
    HW = H * W

    # ---- nearest-neighbour flat source index, precomputed once ------------------
    g = sample_grid + flow                                        # (N, H, W, 2)
    gx = g[..., 0]
    gy = g[..., 1]
    # align_corners=True un-normalize, padding_mode='border' clamp,
    # mode='nearest' round-half-to-even (matches ATen nearbyint / np.rint).
    ix = jnp.clip((gx + 1.0) * (0.5 * (W - 1)), 0.0, float(W - 1))
    iy = jnp.clip((gy + 1.0) * (0.5 * (H - 1)), 0.0, float(H - 1))
    idx = (jnp.round(iy).astype(jnp.int32) * W
           + jnp.round(ix).astype(jnp.int32)).reshape(N, HW)      # (N, HW)

    # ---- tiling / padding --------------------------------------------------------
    TJ = _round_up(min(tile_j, _round_up(HW, 128)), 128)          # output tile
    TK = tile_k if (tile_k <= TJ and TJ % tile_k == 0) else 128   # source chunk, TK | TJ
    HW_pad = _round_up(HW, TJ)                                    # multiple of TJ and TK
    nj = HW_pad // TJ
    nk = HW_pad // TK
    pad = HW_pad - HW

    x_flat = x.reshape(N, C, HW)
    if pad:
        x_flat = jnp.pad(x_flat, ((0, 0), (0, 0), (0, pad)))
        idx = jnp.pad(idx, ((0, 0), (0, pad)), mode="edge")       # keeps bands tight

    # Pre-chunk x so the kernel can index source chunks dynamically on a major axis
    # (robust lowering) while the whole image stays resident in VMEM per batch.
    x_blocked = jnp.transpose(x_flat.reshape(N, C, nk, TK), (0, 2, 1, 3))  # (N, nk, C, TK)
    idx3 = idx.reshape(N, 1, HW_pad)

    # Per-(n, j) contributing-chunk band, scalar-prefetched to SMEM.
    idx_tiles = idx.reshape(N, nj, TJ)
    lo = (jnp.min(idx_tiles, axis=-1) // TK).astype(jnp.int32).reshape(-1)      # (N*nj,)
    hi = (jnp.max(idx_tiles, axis=-1) // TK + 1).astype(jnp.int32).reshape(-1)  # (N*nj,)

    kernel = functools.partial(_st_nearest_kernel, TK=TK)

    out_pad = pl.pallas_call(
        kernel,
        out_shape=jax.ShapeDtypeStruct((N, C, HW_pad), x.dtype),
        grid_spec=pltpu.PrefetchScalarGridSpec(
            num_scalar_prefetch=2,
            grid=(N, nj),
            in_specs=[
                pl.BlockSpec((pl.Squeezed(), nk, C, TK),
                             lambda n, j, lo_r, hi_r: (n, 0, 0, 0)),
                pl.BlockSpec((pl.Squeezed(), 1, TJ),
                             lambda n, j, lo_r, hi_r: (n, 0, j)),
            ],
            out_specs=pl.BlockSpec((pl.Squeezed(), C, TJ),
                                   lambda n, j, lo_r, hi_r: (n, 0, j)),
            scratch_shapes=[pltpu.VMEM((C, TJ), jnp.float32)],
        ),
        compiler_params=pltpu.CompilerParams(
            dimension_semantics=("parallel", "parallel"),
            vmem_limit_bytes=vmem_limit_bytes,
        ),
    )(lo, hi, x_blocked, idx3)

    return out_pad[:, :, :HW].reshape(N, C, H, W)


def _reference_numpy(x, flow, sample_grid):
    # Pure-numpy reference for grid_sample nearest / border / align_corners=True.
    x = np.asarray(x)
    g = np.asarray(sample_grid) + np.asarray(flow)
    N, C, H, W = x.shape
    out = np.zeros_like(x)
    for n in range(N):
        gx = g[n, ..., 0]
        gy = g[n, ..., 1]
        ix = np.clip((gx + 1.0) * 0.5 * (W - 1), 0.0, W - 1)
        iy = np.clip((gy + 1.0) * 0.5 * (H - 1), 0.0, H - 1)
        ixn = np.rint(ix).astype(np.int64)   # round-half-to-even, like ATen
        iyn = np.rint(iy).astype(np.int64)
        out[n] = x[n][:, iyn, ixn]
    return out


if __name__ == "__main__":
    N, C, H, W = 2, 4, 16, 16
    key = jax.random.PRNGKey(0)
    k1, k2 = jax.random.split(key)

    x = jax.random.normal(k1, (N, C, H, W), dtype=jnp.float32)

    # identity sampling grid in normalized [-1, 1] coords, last dim = (x, y)
    ys = jnp.linspace(-1.0, 1.0, H)
    xs = jnp.linspace(-1.0, 1.0, W)
    gy, gx = jnp.meshgrid(ys, xs, indexing="ij")
    sample_grid = jnp.broadcast_to(
        jnp.stack([gx, gy], axis=-1)[None], (N, H, W, 2)).astype(jnp.float32)

    # small random displacement field
    flow = 0.3 * jax.random.normal(k2, (N, H, W, 2), dtype=jnp.float32)

    out = spatial_transform_nearest(x, flow, sample_grid)
    out = jax.block_until_ready(out)

    ref = _reference_numpy(x, flow, sample_grid)
    np.testing.assert_allclose(np.asarray(out), ref, rtol=1e-5, atol=1e-5)

    print("KERNEL_OK")
</pallas_src>

<mosaic_0001>
module attributes {stable_mosaic.version = 11 : i64} {
  func.func @_st_nearest_kernel(%arg0: i32, %arg1: i32, %arg2: memref<2xi32, #tpu.memory_space<smem>>, %arg3: memref<2xi32, #tpu.memory_space<smem>>, %arg4: memref<1x1x4x256xf32, #tpu.memory_space<vmem>>, %arg5: memref<1x1x256xi32, #tpu.memory_space<vmem>>, %arg6: memref<1x4x256xf32, #tpu.memory_space<vmem>>, %arg7: memref<4x256xf32, #tpu.memory_space<vmem>>) attributes {dimension_semantics = [#tpu.dimension_semantics<parallel>, #tpu.dimension_semantics<parallel>], iteration_bounds = array<i64: 2, 1>, scalar_prefetch = 2 : i64, scratch_operands = 1 : i64, tpu.core_type = #tpu.core_type<tc>, window_params = [{transform_indices = @transform_0, window_bounds = array<i64: 1, 1, 4, 256>}, {transform_indices = @transform_1, window_bounds = array<i64: 1, 1, 256>}, {transform_indices = @transform_2, window_bounds = array<i64: 1, 4, 256>}]} {
    %c1_i32 = arith.constant 1 : i32
    %0 = arith.muli %arg0, %c1_i32 : i32
    %1 = arith.addi %0, %arg1 : i32
    %2 = arith.index_cast %1 : i32 to index
    %3 = memref.load %arg2[%2] : memref<2xi32, #tpu.memory_space<smem>>
    %4 = arith.index_cast %1 : i32 to index
    %5 = memref.load %arg3[%4] : memref<2xi32, #tpu.memory_space<smem>>
    %c0 = arith.constant 0 : index
    %c0_0 = arith.constant 0 : index
    %c0_1 = arith.constant 0 : index
    %6 = vector.load %arg5[%c0, %c0_0, %c0_1] : memref<1x1x256xi32, #tpu.memory_space<vmem>>, vector<1x1x256xi32>
    %7 = vector.shape_cast %6 : vector<1x1x256xi32> to vector<1x256xi32>
    %8 = tpu.iota {dimensions = array<i32: 0>} : vector<256x1xi32>
    %c0_2 = arith.constant 0 : index
    %9 = arith.index_cast %3 : i32 to index
    %c0_3 = arith.constant 0 : index
    %c0_4 = arith.constant 0 : index
    %10 = vector.load %arg4[%c0_2, %9, %c0_3, %c0_4] : memref<1x1x4x256xf32, #tpu.memory_space<vmem>>, vector<1x1x4x256xf32>
    %11 = vector.shape_cast %10 : vector<1x1x4x256xf32> to vector<4x256xf32>
    %c256_i32 = arith.constant 256 : i32
    %12 = arith.muli %3, %c256_i32 : i32
    %13 = vector.broadcast %12 : i32 to vector<256x1xi32>
    %14 = arith.addi %8, %13 : vector<256x1xi32>
    %15 = vector.broadcast %14 : vector<256x1xi32> to vector<256x256xi32>
    %16 = vector.broadcast %7 : vector<1x256xi32> to vector<256x256xi32>
    %17 = arith.cmpi eq, %15, %16 : vector<256x256xi32>
    %18 = arith.extui %17 : vector<256x256xi1> to vector<256x256xi32>
    %19 = arith.sitofp %18 : vector<256x256xi32> to vector<256x256xf32>
    %cst = arith.constant dense<0.000000e+00> : vector<4x256xf32>
    %20 = tpu.matmul %11, %19, %cst {dimension_numbers = #tpu.dot_dimension_numbers<[1], [0], [0], [1], [0, 0, 1, 1], [], []>} : vector<4x256xf32>, vector<256x256xf32>, vector<4x256xf32> -> vector<4x256xf32>
    %c0_5 = arith.constant 0 : index
    %c0_6 = arith.constant 0 : index
    %21 = vector.load %arg7[%c0_5, %c0_6] : memref<4x256xf32, #tpu.memory_space<vmem>>, vector<4x256xf32>
    tpu.vector_store %arg7[%c0_5, %c0_6], %20 {strides = array<i32>} : memref<4x256xf32, #tpu.memory_space<vmem>>, vector<4x256xf32>,
    %c1_i32_7 = arith.constant 1 : i32
    %22 = arith.addi %3, %c1_i32_7 : i32
    %23 = arith.subi %5, %22 : i32
    %c1_i32_8 = arith.constant 1 : i32
    %c1_i32_9 = arith.constant 1 : i32
    %24 = arith.subi %c1_i32_8, %c1_i32_9 : i32
    %25 = arith.addi %23, %24 : i32
    %c1_i32_10 = arith.constant 1 : i32
    %26 = arith.divsi %25, %c1_i32_10 : i32
    %c1_i32_11 = arith.constant 1 : i32
    %c0_i32 = arith.constant 0 : i32
    %27 = arith.subi %26, %c0_i32 : i32
    %28 = arith.addi %c0_i32, %27 : i32
    %c1_i32_12 = arith.constant 1 : i32
    scf.for %arg8 = %c0_i32 to %28 step %c1_i32_12  : i32 {
      %33 = arith.muli %arg8, %c1_i32_11 : i32
      %34 = arith.addi %22, %33 : i32
      %c0_18 = arith.constant 0 : index
      %c0_19 = arith.constant 0 : index
      %35 = vector.load %arg7[%c0_18, %c0_19] : memref<4x256xf32, #tpu.memory_space<vmem>>, vector<4x256xf32>
      %c0_20 = arith.constant 0 : index
      %36 = arith.index_cast %34 : i32 to index
      %c0_21 = arith.constant 0 : index
      %c0_22 = arith.constant 0 : index
      %37 = vector.load %arg4[%c0_20, %36, %c0_21, %c0_22] : memref<1x1x4x256xf32, #tpu.memory_space<vmem>>, vector<1x1x4x256xf32>
      %38 = vector.shape_cast %37 : vector<1x1x4x256xf32> to vector<4x256xf32>
      %c256_i32_23 = arith.constant 256 : i32
      %39 = arith.muli %34, %c256_i32_23 : i32
      %40 = vector.broadcast %39 : i32 to vector<256x1xi32>
      %41 = arith.addi %8, %40 : vector<256x1xi32>
      %42 = vector.broadcast %41 : vector<256x1xi32> to vector<256x256xi32>
      %43 = vector.broadcast %7 : vector<1x256xi32> to vector<256x256xi32>
      %44 = arith.cmpi eq, %42, %43 : vector<256x256xi32>
      %45 = arith.extui %44 : vector<256x256xi1> to vector<256x256xi32>
      %46 = arith.sitofp %45 : vector<256x256xi32> to vector<256x256xf32>
      %cst_24 = arith.constant dense<0.000000e+00> : vector<4x256xf32>
      %47 = tpu.matmul %38, %46, %cst_24 {dimension_numbers = #tpu.dot_dimension_numbers<[1], [0], [0], [1], [0, 0, 1, 1], [], []>} : vector<4x256xf32>, vector<256x256xf32>, vector<4x256xf32> -> vector<4x256xf32>
      %48 = arith.addf %35, %47 : vector<4x256xf32>
      %c0_25 = arith.constant 0 : index
      %c0_26 = arith.constant 0 : index
      %49 = vector.load %arg7[%c0_25, %c0_26] : memref<4x256xf32, #tpu.memory_space<vmem>>, vector<4x256xf32>
      tpu.vector_store %arg7[%c0_25, %c0_26], %48 {strides = array<i32>} : memref<4x256xf32, #tpu.memory_space<vmem>>, vector<4x256xf32>,
    }
    %c0_13 = arith.constant 0 : index
    %c0_14 = arith.constant 0 : index
    %29 = vector.load %arg7[%c0_13, %c0_14] : memref<4x256xf32, #tpu.memory_space<vmem>>, vector<4x256xf32>
    %c0_15 = arith.constant 0 : index
    %c0_16 = arith.constant 0 : index
    %c0_17 = arith.constant 0 : index
    %30 = vector.load %arg6[%c0_15, %c0_16, %c0_17] : memref<1x4x256xf32, #tpu.memory_space<vmem>>, vector<1x4x256xf32>
    %31 = vector.shape_cast %30 : vector<1x4x256xf32> to vector<4x256xf32>
    %32 = vector.shape_cast %29 : vector<4x256xf32> to vector<1x4x256xf32>
    tpu.vector_store %arg6[%c0_15, %c0_16, %c0_17], %32 {strides = array<i32>} : memref<1x4x256xf32, #tpu.memory_space<vmem>>, vector<1x4x256xf32>,
    return
  }
  func.func @transform_0(%arg0: i32, %arg1: i32, %arg2: memref<2xi32, #tpu.memory_space<smem>>, %arg3: memref<2xi32, #tpu.memory_space<smem>>) -> (i32, i32, i32, i32) {
    %c0_i32 = arith.constant 0 : i32
    %c0_i32_0 = arith.constant 0 : i32
    %c0_i32_1 = arith.constant 0 : i32
    %c0_i32_2 = arith.constant 0 : i32
    return %arg0, %c0_i32, %c0_i32_0, %c0_i32_1 : i32, i32, i32, i32
  }
  func.func @transform_1(%arg0: i32, %arg1: i32, %arg2: memref<2xi32, #tpu.memory_space<smem>>, %arg3: memref<2xi32, #tpu.memory_space<smem>>) -> (i32, i32, i32) {
    %c0_i32 = arith.constant 0 : i32
    %c0_i32_0 = arith.constant 0 : i32
    return %arg0, %c0_i32, %arg1 : i32, i32, i32
  }
  func.func @transform_2(%arg0: i32, %arg1: i32, %arg2: memref<2xi32, #tpu.memory_space<smem>>, %arg3: memref<2xi32, #tpu.memory_space<smem>>) -> (i32, i32, i32) {
    %c0_i32 = arith.constant 0 : i32
    %c0_i32_0 = arith.constant 0 : i32
    return %arg0, %c0_i32, %arg1 : i32, i32, i32
  }
}

</mosaic_0001>

<bundles_post_ra>
// kernel: tpu_custom_call.1
= control target key start
LH: loop header
LB: loop body
LE: loop exit
PB: predicated region body
PF: predicated region fallthrough
CT: control target
= control target key end

     0   :  { %s2340_s0 = inlined_call_operand.hbm [shape: s32[2], index: 0, kind: input, shape index: {}]   ;;  %s2341_s2 = inlined_call_operand.hbm [shape: f32[2,1,4,256], index: 2, kind: input, shape index: {}]   ;;  %s2342_s3 = inlined_call_operand.vmem [shape: s32[2,1,256], index: 3, kind: input, shape index: {}]   ;;  %s2343_s4 = inlined_call_operand.hbm [shape: f32[2,4,256], index: 4, kind: output, shape index: {}]   ;;  %s2344_s1 = inlined_call_operand.vmem [shape: s32[2], index: 1, kind: input, shape index: {}]  }
   0x1   :  { %s1504_s17 = scalar_lea.hbm %s2340_s0, 16 }
   0x2   :  { %p1505_p0 = scmp.ne.s32.totalorder %s2340_s0, %s1504_s17  ;;  %p1508_p1 = scmp.lt.u32.totalorder %s1504_s17, %s2340_s0 }
   0x4   :  { %p1510_p2 = pnand %p1508_p1, %p1505_p0 }
   0x6   :  { %1513 = shalt.err (!%p1510_p2)  }
   0x7   :  { %s1650_s22 = smov [#allocation4]   ;;  %s11_s27 = sshll.u32 %s2344_s1, 4  ;;  %s12_s27 = int_to_ptr.vmem [resolvable:$true] %s11_s27 }
   0x8   :  { %10 = dma.hbm_to_smem %s2340_s0, 16, %s1650_s22, [#allocation3] }
   0x9   :  { %s1514_s28 = scalar_lea.vmem %s12_s27, 16  ;;  %p1519_p4 = scmp.lt.s32.totalorder %s12_s27, %s12_s27 }
   0xa   :  { %p1515_p3 = scmp.ne.s32.totalorder %s12_s27, %s1514_s28  ;;  %p1520_p5 = scmp.lt.s32.totalorder %s1514_s28, %s1514_s28 }
   0xc   :  { %p1521_p6 = por %p1520_p5, %p1519_p4 }
   0xe   :  { %p1522_p7 = pnand %p1521_p6, %p1515_p3 }
  0x10   :  { %1525 = shalt.err (!%p1522_p7)  }
  0x11   :  { %s1651_s29 = smov [#allocation5]  }
  0x12   :  { %14 = dma.vmem_to_smem %s12_s27, 16, %s1651_s29, [#allocation3] }
  0x13   :  { %1612 = dma.done.wait [#allocation3], 32 }
  0x14   :  { %1613 = vsyncadd [#allocation3], 4294967264 }
  0x15   :  { %16 = sfence }
  0x16   :  { %17 = vsyncpa [#allocation7], 0 }
  0x17   :  { %19 = vsyncpa [#allocation7 + $0x1], 0 }
  0x18   :  { %20 = vsyncpa [#allocation8], 0 }
  0x19   :  { %22 = vsyncpa [#allocation8 + $0x1], 0  ;;  %s1696_s0 = smov 0   ;;  %s1698_s1 = smov 0  }
  0x1a   :  { %s1700_s30 = smov 0   ;;  %s1702_s5 = smov 0  }
  0x1b   :  { %s1704_s6 = smov 0   ;;  %s1706_s7 = smov 0  }
  0x1c LB: > { %s1018_s8 = sadd.s32 4294967295, %s1644_s7   ;;  %s1019_s9 = sadd.s32 4294967294, %s1644_s7   ;;  %s1644_s7 = sphi %s1706_s7, %s28_s7   ;;  %s1640_s6 = sphi %s1704_s6, %s2360_s6   ;;  %s1636_s5 = sphi %s1702_s5, %s2359_s5   ;;  %s1632_s30 = sphi %s1700_s30, %s2358_s30   ;;  %s1628_s1 = sphi %s1698_s1, %s2357_s1   ;;  %s1624_s0 = sphi %s1696_s0, %s2356_s0  }
  0x1d   : > { %s40_s10 = sadd.s32 1, %s1640_s6  ;;  %s47_s11 = sadd.s32 1, %s1632_s30 }
  0x1e   : > { %p42_p8 = scmp.ge.s32.totalorder %s40_s10, 2  ;;  %p54_p9 = scmp.ne.s32.totalorder %s1632_s30, %s1628_s1 }
  0x1f   : > { %p55_p10 = scmp.eq.s32.totalorder %s1644_s7, 0  ;;  %p60_p11 = scmp.ne.s32.totalorder %s1628_s1, %s1624_s0 }
  0x20   : > { %s2362_s10 = smov (%p42_p8, %s40_s10), 0  ;;  %p61_p13 = scmp.eq.s32.totalorder %s1018_s8, 0 }
  0x21   : > { %p1737_p12 = por %p55_p10, %p54_p9  ;;  %s44_s13 = ssub.s32 %s1640_s6, %s2362_s10 }
  0x22   : > { %p114_p0 = scmp.eq.s32.totalorder %s1018_s8, 1  ;;  %p45_p1 = scmp.eq.s32.totalorder %s44_s13, 0 }
  0x23   : > { %p1743_p2 = por %p61_p13, %p60_p11  ;;  %p120_p4 = scmp.eq.s32.totalorder %s1019_s9, 1 }
  0x24   : > { %p1747_p3 = por %p114_p0, %p54_p9  ;;  %p1440_p7 = scmp.lt.s32.totalorder %s1644_s7, 2 }
  0x25   : > { %s1752_s16 = scalar_select %p45_p1, %s1632_s30, %s47_s11  }
  0x26   : > { %s2348_s15 = scalar_select %p1747_p3, 1, 0 }
  0x27   : > { %p1754_p5 = por %p120_p4, %p60_p11  ;;  %s140_s18 = sand.u32 1, %s1632_s30  }
  0x28   : > { %s1022_s19 = sshll.u32 %s140_s18, 3  ;;  %s1297_s20 = sshll.u32 %s1640_s6, 7 }
  0x29   : > { %s2349_s17 = scalar_select %p1754_p5, 1, 0 }
  0x2a   : > { %s1765_s23 = scalar_lea.hbm %s2341_s2, %s1297_s20  ;;  %s144_s24 = scalar_lea.vmem [#allocation6], %s1022_s19 }
  0x2b   : > { %s152_s25 = sshll.u32 %s144_s24, 4  ;;  %p1771_p8 = pnand %p1440_p7, %p1737_p12  ;;  %s1767_s25 = int_to_ptr.vmem [resolvable:$true] %s152_s25 }
  0x2c   : > { %s141_s27 = scalar_lea.sflag [#allocation7], %s140_s18  ;;  %s1526_s28 = scalar_lea.hbm %s1765_s23, 128 }
  0x2d   : > { %p1527_p11 = scmp.ne.s32.totalorder %s1765_s23, %s1526_s28  ;;  %p1528_p13 = pneg %p1771_p8 }
  0x2e   : > { %s1531_s9 = scalar_lea.hbm %s2341_s2, 256  ;;  %p1532_p12 = scmp.lt.u32.totalorder %s1765_s23, %s2341_s2 }
  0x2f   : > { %p1529_p0 = pnand %p1528_p13, %p1527_p11  ;;  %p1533_p4 = scmp.lt.u32.totalorder %s1531_s9, %s1526_s28 }
  0x30   : > { %p1535_p6 = scmp.lt.u32.totalorder %s1526_s28, %s1765_s23 }
  0x31   : > { %p1530_p1 = pneg %p1529_p0  ;;  %p1534_p7 = por %p1533_p4, %p1532_p12 }
  0x33   : > { %p1536_p9 = por %p1535_p6, %p1534_p7 }
  0x35   : > { %p1537_p10 = pnand %p1536_p9, %p1530_p1 }
  0x37   : > { %1540 = shalt.err (!%p1537_p10)
}
  0x38   : > { %s1541_s13 = scalar_lea.vmem %s1767_s25, 128  ;;  %s1652_s18 = smov [#allocation6]  }
  0x39   : > { %p1542_p11 = scmp.ne.s32.totalorder %s1767_s25, %s1541_s13  ;;  %s1546_s19 = sshll.u32 %s1652_s18, 4  ;;  %s1547_s19 = int_to_ptr.vmem [resolvable:$false] %s1546_s19 }
  0x3a   : > { %s1548_s20 = scalar_lea.vmem %s1547_s19, 256  ;;  %p1549_p3 = scmp.lt.s32.totalorder %s1767_s25, %s1547_s19 }
  0x3b   : > { %p1544_p0 = pnand %p1542_p11, %p1528_p13  ;;  %p1550_p12 = scmp.lt.s32.totalorder %s1548_s20, %s1541_s13 }
  0x3d   : > { %p1545_p5 = pneg %p1544_p0  ;;  %p1551_p4 = por %p1550_p12, %p1549_p3 }
  0x3f   : > { %p1552_p6 = pnand %p1551_p4, %p1545_p5 }
  0x41   : > { %1555 = shalt.err (!%p1552_p6)
}
  0x42   : > { %1435 = dma.hbm_to_vmem [thread:$0]  (!%p1771_p8), %s1765_s23, 128, %s1767_s25, %s141_s27  }
  0x43   : > { %p2351_p9 = scmp.lt.s32.totalorder %s1644_s7, 3  ;;  %p2352_p10 = scmp.ge.s32.totalorder %s1644_s7, 1 }
  0x45   : > { %p170_p13 = pnand %p2352_p10, %p2351_p9 }
  0x46   : > { %s1807_s21 = sand.u32 (!%p170_p13), 1, %s1628_s1  }
  0x47   : > { %173 = sbr.rel (%p170_p13) target bundleno = 685 (0x2ad), region = 28  ;;  %s1026_s22 = sshll.u32 (!%p170_p13), %s1807_s21, 3 }
  0x48   : > { %s176_s24 = scalar_lea.sflag (!%p170_p13), [#allocation7], %s1807_s21  ;;  %s1813_s26 = scalar_lea.vmem (!%p170_p13), [#allocation6], %s1026_s22 }
  0x4e   : > { %1615 = dma.done.wait (%p1743_p2), %s176_s24, 128  }
  0x4f   : > { %1617 = vsyncadd (%p1743_p2), %s176_s24, 4294967168  ;;  %p209_p3 = scmp.lt.s32.totalorder %s1636_s5, 1  ;;  %v222_v0 = vlaneseq  ;;  %s1821_s23 = sld [smem:[#allocation4 + %s1636_s5]]  ;;  %v1653_v23 = vmov 1.0|1.0  }
  0x50   : > { %s220_s25 = sld [smem:[#allocation5 + %s1636_s5]]  ;;  %s2106_s19 = scalar_lea.vmem [#allocation9], %s1026_s22 }
  0x51   : > { %s210_s27 = scalar_select %p209_p3, %s1636_s5, 1  ;;  %v1825_v1 = vshrl.u32 %v222_v0, 7 }
  0x53   : > { %s1028_s28 = sshll.u32 %s210_s27, 1  ;;  %v295_v2 = vsub.s32 0, %v1825_v1  ;;  %v299_v3 = vsub.s32 1, %v1825_v1  ;;  %v1833_v4 = vadd.s32 8, %v1825_v1  ;;  %v1836_v5 = vadd.s32 16, %v1825_v1 }
  0x54   : > { %s215_s8 = scalar_lea.vmem %s2342_s3, %s1028_s28  ;;  %v1839_v6 = vadd.s32 24, %v1825_v1  ;;  %v1842_v7 = vadd.s32 32, %v1825_v1  ;;  %v1845_v8 = vadd.s32 40, %v1825_v1  ;;  %v1850_v10 = vadd.s32 48, %v1825_v1 }
  0x55   : > { %v221_v9 = vld [vmem:[%s215_s8] sm:$0x3]  ;;  %s1031_s9 = sshll.u32 %s1821_s23, 8  ;;  %s572_s11 = sadd.s32 1, %s1821_s23  ;;  %v1863_v14 = vadd.s32 56, %v1825_v1  ;;  %v1878_v21 = vadd.s32 64, %v1825_v1 }
  0x56   : > { %v1852_v11 = vstv %s1031_s9  ;;  %v1854_v12 = vrot.slane %v221_v9, %v295_v2  ;;  %v1856_v13 = vrot.slane %v221_v9, %v299_v3  ;;  %s1860_s12 = ssub.s32 %s220_s25, %s572_s11  ;;  %v1881_v22 = vadd.s32 72, %v1825_v1  ;;  %s1298_s13 = sshll.u32 %s1821_s23, 3 }
  0x57   : > { %v261_v15 = vadd.s32 %v1852_v11, %v1825_v1  ;;  %v262_v16 = vadd.s32 %v1852_v11, %v1833_v4  ;;  %v263_v17 = vadd.s32 %v1852_v11, %v1836_v5  ;;  %v264_v18 = vadd.s32 %v1852_v11, %v1839_v6  ;;  %s257_s18 = scalar_lea.vmem %s1813_s26, %s1298_s13 [#allocation6]  ;;  %p1160_p2 = scmp.le.s32.totalorder %s1860_s12, 0 }
  0x58   : > { %v265_v19 = vadd.s32 %v1852_v11, %v1842_v7  ;;  %v266_v20 = vadd.s32 %v1852_v11, %v1845_v8  ;;  %v267_v24 = vadd.s32 %v1852_v11, %v1850_v10  ;;  %v268_v25 = vadd.s32 %v1852_v11, %v1863_v14  ;;  %v1980_v46 = vld [vmem:[%s257_s18] sm:$0xff]  ;;  %s2109_s20 = smov (!%p1160_p2), 0  }
  0x59   : > { %vm302_vm0 = vcmp.eq.s32.totalorder %v261_v15, %v1856_v13  ;;  %vm304_vm1 = vcmp.eq.s32.totalorder %v262_v16, %v1856_v13  ;;  %vm301_vm2 = vcmp.eq.s32.totalorder %v261_v15, %v1854_v12  ;;  %vm303_vm3 = vcmp.eq.s32.totalorder %v262_v16, %v1854_v12 }
  0x5a   : > { %vm1300_vm4 = vmpackc.low %vm304_vm1, %vm302_vm0  ;;  %vm306_vm5 = vcmp.eq.s32.totalorder %v263_v17, %v1856_v13  ;;  %vm308_vm6 = vcmp.eq.s32.totalorder %v264_v18, %v1856_v13  ;;  %vm305_vm7 = vcmp.eq.s32.totalorder %v263_v17, %v1854_v12  ;;  %vm307_vm8 = vcmp.eq.s32.totalorder %v264_v18, %v1854_v12 }
  0x5b   : > { %1301 = vmatprep.subr.msk.bf16.mxu0 %vm1300_vm4, %v1653_v23  ;;  %vm1302_vm9 = vmpackc.low %vm303_vm3, %vm301_vm2  ;;  %vm310_vm10 = vcmp.eq.s32.totalorder %v265_v19, %v1856_v13  ;;  %vm312_vm11 = vcmp.eq.s32.totalorder %v266_v20, %v1856_v13  ;;  %vm309_vm15 = vcmp.eq.s32.totalorder %v265_v19, %v1854_v12  ;;  %vm311_vm0 = vcmp.eq.s32.totalorder %v266_v20, %v1854_v12 }
  0x5c   : > { %1303 = vmatpush1.bf16.msk.msra.mxu0 %vm1302_vm9, %v1653_v23  ;;  %vm1304_vm12 = vmpackc.low %vm308_vm6, %vm306_vm5  ;;  %v1903_v26 = vadd.s32 80, %v1825_v1  ;;  %v1906_v27 = vadd.s32 88, %v1825_v1  ;;  %vm314_vm1 = vcmp.eq.s32.totalorder %v267_v24, %v1856_v13  ;;  %vm316_vm2 = vcmp.eq.s32.totalorder %v268_v25, %v1856_v13 }
  0x5d   : > { %1305 = vmatprep.subr.msk.bf16.mxu0 %vm1304_vm12, %v1653_v23  ;;  %vm1306_vm13 = vmpackc.low %vm307_vm8, %vm305_vm7  ;;  %v269_v28 = vadd.s32 %v1852_v11, %v1878_v21  ;;  %v270_v29 = vadd.s32 %v1852_v11, %v1881_v22  ;;  %vm313_vm5 = vcmp.eq.s32.totalorder %v267_v24, %v1854_v12  ;;  %vm315_vm6 = vcmp.eq.s32.totalorder %v268_v25, %v1854_v12 }
  0x5e   : > { %vm1308_vm14 = vmpackc.low %vm312_vm11, %vm310_vm10  ;;  %v1919_v30 = vadd.s32 96, %v1825_v1  ;;  %v1922_v31 = vadd.s32 104, %v1825_v1  ;;  %v271_v32 = vadd.s32 %v1852_v11, %v1903_v26  ;;  %v272_v33 = vadd.s32 %v1852_v11, %v1906_v27 }
  0x5f   : > { %vm1310_vm3 = vmpackc.low %vm311_vm0, %vm309_vm15  ;;  %vm318_vm7 = vcmp.eq.s32.totalorder %v269_v28, %v1856_v13  ;;  %vm320_vm8 = vcmp.eq.s32.totalorder %v270_v29, %v1856_v13  ;;  %vm317_vm11 = vcmp.eq.s32.totalorder %v269_v28, %v1854_v12  ;;  %vm319_vm12 = vcmp.eq.s32.totalorder %v270_v29, %v1854_v12 }
  0x60   : > { %1307 = vmatpush1.bf16.msk.msra.mxu0 %vm1306_vm13, %v1653_v23  ;;  %vm1312_vm4 = vmpackc.low %vm316_vm2, %vm314_vm1  ;;  %v273_v34 = vadd.s32 %v1852_v11, %v1919_v30  ;;  %v274_v35 = vadd.s32 %v1852_v11, %v1922_v31  ;;  %vm322_vm13 = vcmp.eq.s32.totalorder %v271_v32, %v1856_v13  ;;  %v1941_v36 = vadd.s32 112, %v1825_v1 }
  0x61   : > { %1309 = vmatprep.subr.msk.bf16.mxu0 %vm1308_vm14, %v1653_v23  ;;  %vm1314_vm9 = vmpackc.low %vm315_vm6, %vm313_vm5  ;;  %vm324_vm14 = vcmp.eq.s32.totalorder %v272_v33, %v1856_v13  ;;  %v1944_v37 = vadd.s32 120, %v1825_v1  ;;  %vm321_vm1 = vcmp.eq.s32.totalorder %v271_v32, %v1854_v12  ;;  %vm323_vm2 = vcmp.eq.s32.totalorder %v272_v33, %v1854_v12 }
  0x62   : > { %vm1316_vm10 = vmpackc.low %vm320_vm8, %vm318_vm7  ;;  %v275_v38 = vadd.s32 %v1852_v11, %v1941_v36  ;;  %v1958_v40 = vadd.s32 128, %v1825_v1  ;;  %v1961_v41 = vadd.s32 136, %v1825_v1  ;;  %vm325_vm7 = vcmp.eq.s32.totalorder %v273_v34, %v1854_v12 }
  0x63   : > { %vm1318_vm15 = vmpackc.low %vm319_vm12, %vm317_vm11  ;;  %v276_v39 = vadd.s32 %v1852_v11, %v1944_v37  ;;  %vm327_vm8 = vcmp.eq.s32.totalorder %v274_v35, %v1854_v12  ;;  %v1969_v42 = vadd.s32 144, %v1825_v1  ;;  %v1972_v43 = vadd.s32 152, %v1825_v1 }
  0x64   : > { %1311 = vmatpush1.bf16.msk.msra.mxu0 %vm1310_vm3, %v1653_v23  ;;  %vm1320_vm0 = vmpackc.low %vm324_vm14, %vm322_vm13  ;;  %vm326_vm3 = vcmp.eq.s32.totalorder %v273_v34, %v1856_v13  ;;  %v277_v44 = vadd.s32 %v1852_v11, %v1958_v40  ;;  %v278_v45 = vadd.s32 %v1852_v11, %v1961_v41  ;;  %v1985_v47 = vadd.s32 160, %v1825_v1 }
  0x65   : > { %1313 = vmatprep.subr.msk.bf16.mxu0 %vm1312_vm4, %v1653_v23  ;;  %vm328_vm4 = vcmp.eq.s32.totalorder %v274_v35, %v1856_v13  ;;  %vm1322_vm5 = vmpackc.low %vm323_vm2, %vm321_vm1  ;;  %vm329_vm13 = vcmp.eq.s32.totalorder %v275_v38, %v1854_v12  ;;  %vm331_vm14 = vcmp.eq.s32.totalorder %v276_v39, %v1854_v12  ;;  %v1990_v48 = vadd.s32 168, %v1825_v1 }
  0x66   : > { %vm1324_vm6 = vmpackc.low %vm328_vm4, %vm326_vm3  ;;  %v494_v49 = vcombine.high %v1980_v46, %v1980_v46  ;;  %v279_v50 = vadd.s32 %v1852_v11, %v1969_v42  ;;  %v280_v51 = vadd.s32 %v1852_v11, %v1972_v43  ;;  %vm333_vm3 = vcmp.eq.s32.totalorder %v277_v44, %v1854_v12 }
  0x67   : > { %vm1326_vm11 = vmpackc.low %vm327_vm8, %vm325_vm7  ;;  %vm335_vm4 = vcmp.eq.s32.totalorder %v278_v45, %v1854_v12  ;;  %v281_v52 = vadd.s32 %v1852_v11, %v1985_v47  ;;  %v282_v53 = vadd.s32 %v1852_v11, %v1990_v48  ;;  %v2011_v54 = vadd.s32 176, %v1825_v1 }
  0x68   : > { %1315 = vmatpush1.bf16.msk.msra.mxu0 %vm1314_vm9, %v1653_v23  ;;  %vm330_vm9 = vcmp.eq.s32.totalorder %v275_v38, %v1856_v13  ;;  %vm1330_vm1 = vmpackc.low %vm331_vm14, %vm329_vm13  ;;  %560 = vmatprep.mubr.f32.mxu0 %v494_v49  ;;  %v2014_v55 = vadd.s32 184, %v1825_v1  ;;  %v2027_v58 = vadd.s32 192, %v1825_v1  ;;  %v2030_v59 = vadd.s32 200, %v1825_v1 }
  0x69   : > { %1317 = vmatprep.subr.msk.bf16.mxu0 %vm1316_vm10, %v1653_v23  ;;  %vm332_vm10 = vcmp.eq.s32.totalorder %v276_v39, %v1856_v13  ;;  %vm1334_vm7 = vmpackc.low %vm335_vm4, %vm333_vm3  ;;  %v283_v56 = vadd.s32 %v1852_v11, %v2011_v54  ;;  %v2037_v60 = vadd.s32 208, %v1825_v1  ;;  %v2040_v61 = vadd.s32 216, %v1825_v1 }
  0x6a   : > { %vm1328_vm12 = vmpackc.low %vm332_vm10, %vm330_vm9  ;;  %vm337_vm9 = vcmp.eq.s32.totalorder %v279_v50, %v1854_v12  ;;  %vm339_vm10 = vcmp.eq.s32.totalorder %v280_v51, %v1854_v12  ;;  %v284_v57 = vadd.s32 %v1852_v11, %v2014_v55  ;;  %v285_v62 = vadd.s32 %v1852_v11, %v2027_v58 }
  0x6b   : > { %vm1338_vm13 = vmpackc.low %vm339_vm10, %vm337_vm9  ;;  %v286_v63 = vadd.s32 %v1852_v11, %v2030_v59  ;;  %v2053_v0 = vadd.s32 224, %v1825_v1  ;;  %v2056_v2 = vadd.s32 232, %v1825_v1  ;;  %v287_v3 = vadd.s32 %v1852_v11, %v2037_v60 }
  0x6c   : > { %1319 = vmatpush1.bf16.msk.msra.mxu0 %vm1318_vm15, %v1653_v23  ;;  %vm334_vm15 = vcmp.eq.s32.totalorder %v277_v44, %v1856_v13  ;;  %v288_v9 = vadd.s32 %v1852_v11, %v2040_v61  ;;  %v2075_v17 = vadd.s32 240, %v1825_v1  ;;  %v2078_v18 = vadd.s32 248, %v1825_v1 }
  0x6d   : > { %1321 = vmatprep.subr.msk.bf16.mxu0 %vm1320_vm0, %v1653_v23  ;;  %vm336_vm0 = vcmp.eq.s32.totalorder %v278_v45, %v1856_v13  ;;  %v289_v15 = vadd.s32 %v1852_v11, %v2053_v0  ;;  %v290_v16 = vadd.s32 %v1852_v11, %v2056_v2 }
  0x6e   : > { %vm1332_vm2 = vmpackc.low %vm336_vm0, %vm334_vm15  ;;  %vm341_vm15 = vcmp.eq.s32.totalorder %v281_v52, %v1854_v12  ;;  %vm343_vm0 = vcmp.eq.s32.totalorder %v282_v53, %v1854_v12  ;;  %v291_v19 = vadd.s32 %v1852_v11, %v2075_v17  ;;  %v292_v20 = vadd.s32 %v1852_v11, %v2078_v18 }
  0x6f   : > { %vm1342_vm3 = vmpackc.low %vm343_vm0, %vm341_vm15 }
  0x70   : > { %1323 = vmatpush1.bf16.msk.msra.mxu0 %vm1322_vm5, %v1653_v23  ;;  %vm338_vm5 = vcmp.eq.s32.totalorder %v279_v50, %v1856_v13 }
  0x71   : > { %1325 = vmatprep.subr.msk.bf16.mxu0 %vm1324_vm6, %v1653_v23  ;;  %vm340_vm6 = vcmp.eq.s32.totalorder %v280_v51, %v1856_v13 }
  0x72   : > { %vm1336_vm8 = vmpackc.low %vm340_vm6, %vm338_vm5  ;;  %vm345_vm5 = vcmp.eq.s32.totalorder %v283_v56, %v1854_v12  ;;  %vm347_vm6 = vcmp.eq.s32.totalorder %v284_v57, %v1854_v12 }
  0x73   : > { %vm1346_vm9 = vmpackc.low %vm347_vm6, %vm345_vm5 }
  0x74   : > { %1327 = vmatpush1.bf16.msk.msra.mxu0 %vm1326_vm11, %v1653_v23  ;;  %vm342_vm11 = vcmp.eq.s32.totalorder %v281_v52, %v1856_v13 }
  0x75   : > { %1329 = vmatprep.subr.msk.bf16.mxu0 %vm1328_vm12, %v1653_v23  ;;  %vm344_vm12 = vcmp.eq.s32.totalorder %v282_v53, %v1856_v13 }
  0x76   : > { %vm1340_vm14 = vmpackc.low %vm344_vm12, %vm342_vm11  ;;  %vm349_vm11 = vcmp.eq.s32.totalorder %v285_v62, %v1854_v12  ;;  %vm351_vm12 = vcmp.eq.s32.totalorder %v286_v63, %v1854_v12 }
  0x77   : > { %vm1350_vm15 = vmpackc.low %vm351_vm12, %vm349_vm11 }
  0x78   : > { %1331 = vmatpush1.bf16.msk.msra.mxu0 %vm1330_vm1, %v1653_v23  ;;  %vm346_vm1 = vcmp.eq.s32.totalorder %v283_v56, %v1856_v13 }
  0x79   : > { %1333 = vmatprep.subr.msk.bf16.mxu0 %vm1332_vm2, %v1653_v23  ;;  %vm348_vm2 = vcmp.eq.s32.totalorder %v284_v57, %v1856_v13 }
  0x7a   : > { %vm1344_vm4 = vmpackc.low %vm348_vm2, %vm346_vm1  ;;  %vm353_vm1 = vcmp.eq.s32.totalorder %v287_v3, %v1854_v12  ;;  %vm355_vm2 = vcmp.eq.s32.totalorder %v288_v9, %v1854_v12 }
  0x7b   : > { %vm1354_vm5 = vmpackc.low %vm355_vm2, %vm353_vm1 }
  0x7c   : > { %1335 = vmatpush1.bf16.msk.msra.mxu0 %vm1334_vm7, %v1653_v23  ;;  %vm350_vm7 = vcmp.eq.s32.totalorder %v285_v62, %v1856_v13 }
  0x7d   : > { %1337 = vmatprep.subr.msk.bf16.mxu0 %vm1336_vm8, %v1653_v23  ;;  %vm352_vm8 = vcmp.eq.s32.totalorder %v286_v63, %v1856_v13 }
  0x7e   : > { %vm1348_vm10 = vmpackc.low %vm352_vm8, %vm350_vm7  ;;  %vm357_vm7 = vcmp.eq.s32.totalorder %v289_v15, %v1854_v12  ;;  %vm359_vm8 = vcmp.eq.s32.totalorder %v290_v16, %v1854_v12 }
  0x7f   : > { %vm1358_vm11 = vmpackc.low %vm359_vm8, %vm357_vm7 }
  0x80   : > { %1339 = vmatpush1.bf16.msk.msra.mxu0 %vm1338_vm13, %v1653_v23  ;;  %vm354_vm13 = vcmp.eq.s32.totalorder %v287_v3, %v1856_v13 }
  0x81   : > { %1341 = vmatprep.subr.msk.bf16.mxu0 %vm1340_vm14, %v1653_v23  ;;  %vm356_vm14 = vcmp.eq.s32.totalorder %v288_v9, %v1856_v13 }
  0x82   : > { %vm1352_vm0 = vmpackc.low %vm356_vm14, %vm354_vm13  ;;  %vm361_vm13 = vcmp.eq.s32.totalorder %v291_v19, %v1854_v12  ;;  %vm363_vm14 = vcmp.eq.s32.totalorder %v292_v20, %v1854_v12 }
  0x84   : > { %1343 = vmatpush1.bf16.msk.msra.mxu0 %vm1342_vm3, %v1653_v23  ;;  %vm358_vm3 = vcmp.eq.s32.totalorder %v289_v15, %v1856_v13 }
  0x85   : > { %1345 = vmatprep.subr.msk.bf16.mxu0 %vm1344_vm4, %v1653_v23  ;;  %vm360_vm4 = vcmp.eq.s32.totalorder %v290_v16, %v1856_v13 }
  0x86   : > { %vm1356_vm6 = vmpackc.low %vm360_vm4, %vm358_vm3 }
  0x88   : > { %1347 = vmatpush1.bf16.msk.msra.mxu0 %vm1346_vm9, %v1653_v23  ;;  %vm362_vm9 = vcmp.eq.s32.totalorder %v291_v19, %v1856_v13 }
  0x89   : > { %1349 = vmatprep.subr.msk.bf16.mxu0 %vm1348_vm10, %v1653_v23  ;;  %vm364_vm10 = vcmp.eq.s32.totalorder %v292_v20, %v1856_v13 }
  0x8a   : > { %vm1360_vm12 = vmpackc.low %vm364_vm10, %vm362_vm9 }
  0x8c   : > { %1351 = vmatpush1.bf16.msk.msra.mxu0 %vm1350_vm15, %v1653_v23  ;;  %vm1362_vm15 = vmpackc.low %vm363_vm14, %vm361_vm13 }
  0x8d   : > { %1353 = vmatprep.subr.msk.bf16.mxu0 %vm1352_vm0, %v1653_v23 }
  0x90   : > { %1355 = vmatpush1.bf16.msk.msra.mxu0 %vm1354_vm5, %v1653_v23 }
  0x91   : > { %1357 = vmatprep.subr.msk.bf16.mxu0 %vm1356_vm6, %v1653_v23 }
  0x94   : > { %1359 = vmatpush1.bf16.msk.msra.mxu0 %vm1358_vm11, %v1653_v23 }
  0x95   : > { %1361 = vmatprep.subr.msk.bf16.mxu0 %vm1360_vm12, %v1653_v23 }
  0x98   : > { %1363 = vmatpush1.bf16.msk.msra.mxu0 %vm1362_vm15, %v1653_v23 }
  0x9b   : > { %561 = vmatmul.mubr.f32.vlgmr.msra.gmra.mrb[0].mxu0 %v1980_v46 }
 0x16c   : > { %977 = sbr.rel (%p1160_p2) target bundleno = 660 (0x294), region = 79 }
 0x16e   : > { %v562_v11 = vpop.f32.mrb[0].mxu0 }
 0x16f   : > { %v564_v24 = vpop.f32.mrb[1].mxu0 }
 0x170   : > { %v569_v25 = vcombine.low %v562_v11, %v564_v24 }
 0x172   : > { %571 = vst [vmem:[#allocation2] sm:$0xff] %v569_v25 }
 0x173 LB: >> { %s580_s24 = sadd.s32 %s1648_s20, %s572_s11  ;;  %v1654_v38 = vmov 1.0|1.0   ;;  %s960_s22 = sadd.s32 %s1648_s20, %s1821_s23  ;;  %s1648_s20 = sphi %s2109_s20, %s577_s20  }
 0x174   : >> { %s1163_s25 = sshll.u32 %s580_s24, 8  ;;  %s1161_s27 = sshll.u32 %s960_s22, 3 }
 0x175   : >> { %v2117_v23 = vstv %s1163_s25  ;;  %s962_s28 = scalar_lea.vmem %s1813_s26, %s1161_s27 [#allocation6]  ;;  %s577_s20 = sadd.s32 1, %s1648_s20  }
 0x176   : >> { %v588_v28 = vadd.s32 %v2117_v23, %v1825_v1  ;;  %v589_v29 = vadd.s32 %v2117_v23, %v1833_v4  ;;  %v590_v32 = vadd.s32 %v2117_v23, %v1836_v5  ;;  %v591_v33 = vadd.s32 %v2117_v23, %v1839_v6  ;;  %v2190_v57 = vld [vmem:[%s962_s28 + $0x8] sm:$0xff]  ;;  %p576_p5 = scmp.ge.s32.totalorder %s577_s20, %s1860_s12 }
 0x177   : >> { %v592_v34 = vadd.s32 %v2117_v23, %v1842_v7  ;;  %v593_v35 = vadd.s32 %v2117_v23, %v1845_v8  ;;  %v594_v39 = vadd.s32 %v2117_v23, %v1850_v10  ;;  %v595_v44 = vadd.s32 %v2117_v23, %v1863_v14 }
 0x178   : >> { %vm621_vm0 = vcmp.eq.s32.totalorder %v588_v28, %v1856_v13  ;;  %vm623_vm1 = vcmp.eq.s32.totalorder %v589_v29, %v1856_v13  ;;  %vm620_vm2 = vcmp.eq.s32.totalorder %v588_v28, %v1854_v12  ;;  %vm622_vm3 = vcmp.eq.s32.totalorder %v589_v29, %v1854_v12 }
 0x179   : >> { %vm1364_vm4 = vmpackc.low %vm623_vm1, %vm621_vm0  ;;  %vm625_vm5 = vcmp.eq.s32.totalorder %v590_v32, %v1856_v13  ;;  %vm627_vm6 = vcmp.eq.s32.totalorder %v591_v33, %v1856_v13  ;;  %vm624_vm7 = vcmp.eq.s32.totalorder %v590_v32, %v1854_v12  ;;  %vm626_vm8 = vcmp.eq.s32.totalorder %v591_v33, %v1854_v12 }
 0x17a   : >> { %1365 = vmatprep.subr.msk.bf16.mxu0 %vm1364_vm4, %v1654_v38  ;;  %vm1366_vm9 = vmpackc.low %vm622_vm3, %vm620_vm2  ;;  %vm629_vm10 = vcmp.eq.s32.totalorder %v592_v34, %v1856_v13  ;;  %vm631_vm11 = vcmp.eq.s32.totalorder %v593_v35, %v1856_v13  ;;  %vm628_vm15 = vcmp.eq.s32.totalorder %v592_v34, %v1854_v12  ;;  %vm630_vm0 = vcmp.eq.s32.totalorder %v593_v35, %v1854_v12 }
 0x17b   : >> { %1367 = vmatpush1.bf16.msk.msra.mxu0 %vm1366_vm9, %v1654_v38  ;;  %vm1368_vm12 = vmpackc.low %vm627_vm6, %vm625_vm5  ;;  %vm633_vm1 = vcmp.eq.s32.totalorder %v594_v39, %v1856_v13  ;;  %vm635_vm2 = vcmp.eq.s32.totalorder %v595_v44, %v1856_v13  ;;  %v596_v45 = vadd.s32 %v2117_v23, %v1878_v21  ;;  %v597_v46 = vadd.s32 %v2117_v23, %v1881_v22 }
 0x17c   : >> { %1369 = vmatprep.subr.msk.bf16.mxu0 %vm1368_vm12, %v1654_v38  ;;  %vm1370_vm13 = vmpackc.low %vm626_vm8, %vm624_vm7  ;;  %vm632_vm5 = vcmp.eq.s32.totalorder %v594_v39, %v1854_v12  ;;  %vm634_vm6 = vcmp.eq.s32.totalorder %v595_v44, %v1854_v12  ;;  %v598_v49 = vadd.s32 %v2117_v23, %v1903_v26  ;;  %v599_v50 = vadd.s32 %v2117_v23, %v1906_v27  ;;  %v581_v39 = vld [vmem:[#allocation2] sm:$0xff] }
 0x17d   : >> { %vm1372_vm14 = vmpackc.low %vm631_vm11, %vm629_vm10  ;;  %vm637_vm7 = vcmp.eq.s32.totalorder %v596_v45, %v1856_v13  ;;  %vm639_vm8 = vcmp.eq.s32.totalorder %v597_v46, %v1856_v13  ;;  %vm636_vm11 = vcmp.eq.s32.totalorder %v596_v45, %v1854_v12  ;;  %vm638_vm12 = vcmp.eq.s32.totalorder %v597_v46, %v1854_v12 }
 0x17e   : >> { %vm1374_vm3 = vmpackc.low %vm630_vm0, %vm628_vm15  ;;  %v600_v51 = vadd.s32 %v2117_v23, %v1919_v30  ;;  %v601_v52 = vadd.s32 %v2117_v23, %v1922_v31  ;;  %v602_v53 = vadd.s32 %v2117_v23, %v1941_v36  ;;  %v603_v56 = vadd.s32 %v2117_v23, %v1944_v37 }
 0x17f   : >> { %1371 = vmatpush1.bf16.msk.msra.mxu0 %vm1370_vm13, %v1654_v38  ;;  %vm1376_vm4 = vmpackc.low %vm635_vm2, %vm633_vm1  ;;  %vm641_vm13 = vcmp.eq.s32.totalorder %v598_v49, %v1856_v13  ;;  %vm640_vm1 = vcmp.eq.s32.totalorder %v598_v49, %v1854_v12  ;;  %vm642_vm2 = vcmp.eq.s32.totalorder %v599_v50, %v1854_v12  ;;  %v604_v62 = vadd.s32 %v2117_v23, %v1958_v40 }
 0x180   : >> { %1373 = vmatprep.subr.msk.bf16.mxu0 %vm1372_vm14, %v1654_v38  ;;  %vm1378_vm9 = vmpackc.low %vm634_vm6, %vm632_vm5  ;;  %vm643_vm14 = vcmp.eq.s32.totalorder %v599_v50, %v1856_v13  ;;  %v605_v63 = vadd.s32 %v2117_v23, %v1961_v41  ;;  %v813_v3 = vcombine.high %v2190_v57, %v2190_v57  ;;  %v606_v9 = vadd.s32 %v2117_v23, %v1969_v42 }
 0x181   : >> { %vm1380_vm10 = vmpackc.low %vm639_vm8, %vm637_vm7  ;;  %vm644_vm7 = vcmp.eq.s32.totalorder %v600_v51, %v1854_v12  ;;  %vm646_vm8 = vcmp.eq.s32.totalorder %v601_v52, %v1854_v12  ;;  %v607_v15 = vadd.s32 %v2117_v23, %v1972_v43  ;;  %v608_v16 = vadd.s32 %v2117_v23, %v1985_v47 }
 0x182   : >> { %vm1382_vm15 = vmpackc.low %vm638_vm12, %vm636_vm11  ;;  %879 = vmatprep.mubr.f32.mxu0 %v813_v3  ;;  %v609_v19 = vadd.s32 %v2117_v23, %v1990_v48  ;;  %v610_v20 = vadd.s32 %v2117_v23, %v2011_v54  ;;  %v611_v11 = vadd.s32 %v2117_v23, %v2014_v55  ;;  %v612_v24 = vadd.s32 %v2117_v23, %v2027_v58 }
 0x183   : >> { %1375 = vmatpush1.bf16.msk.msra.mxu0 %vm1374_vm3, %v1654_v38  ;;  %vm1384_vm0 = vmpackc.low %vm643_vm14, %vm641_vm13  ;;  %vm645_vm3 = vcmp.eq.s32.totalorder %v600_v51, %v1856_v13  ;;  %vm648_vm13 = vcmp.eq.s32.totalorder %v602_v53, %v1854_v12  ;;  %vm650_vm14 = vcmp.eq.s32.totalorder %v603_v56, %v1854_v12  ;;  %v613_v25 = vadd.s32 %v2117_v23, %v2030_v59 }
 0x184   : >> { %1377 = vmatprep.subr.msk.bf16.mxu0 %vm1376_vm4, %v1654_v38  ;;  %vm647_vm4 = vcmp.eq.s32.totalorder %v601_v52, %v1856_v13  ;;  %vm1386_vm5 = vmpackc.low %vm642_vm2, %vm640_vm1  ;;  %v614_v28 = vadd.s32 %v2117_v23, %v2037_v60  ;;  %v615_v29 = vadd.s32 %v2117_v23, %v2040_v61  ;;  %v616_v32 = vadd.s32 %v2117_v23, %v2053_v0 }
 0x185   : >> { %vm1388_vm6 = vmpackc.low %vm647_vm4, %vm645_vm3  ;;  %vm652_vm3 = vcmp.eq.s32.totalorder %v604_v62, %v1854_v12  ;;  %vm654_vm4 = vcmp.eq.s32.totalorder %v605_v63, %v1854_v12  ;;  %v617_v33 = vadd.s32 %v2117_v23, %v2056_v2  ;;  %v618_v34 = vadd.s32 %v2117_v23, %v2075_v17 }
 0x186   : >> { %vm1390_vm11 = vmpackc.low %vm646_vm8, %vm644_vm7  ;;  %v619_v35 = vadd.s32 %v2117_v23, %v2078_v18 }
 0x187   : >> { %1379 = vmatpush1.bf16.msk.msra.mxu0 %vm1378_vm9, %v1654_v38  ;;  %vm649_vm9 = vcmp.eq.s32.totalorder %v602_v53, %v1856_v13  ;;  %vm1394_vm1 = vmpackc.low %vm650_vm14, %vm648_vm13 }
 0x188   : >> { %1381 = vmatprep.subr.msk.bf16.mxu0 %vm1380_vm10, %v1654_v38  ;;  %vm651_vm10 = vcmp.eq.s32.totalorder %v603_v56, %v1856_v13  ;;  %vm1398_vm7 = vmpackc.low %vm654_vm4, %vm652_vm3 }
 0x189   : >> { %vm1392_vm12 = vmpackc.low %vm651_vm10, %vm649_vm9  ;;  %vm656_vm9 = vcmp.eq.s32.totalorder %v606_v9, %v1854_v12  ;;  %vm658_vm10 = vcmp.eq.s32.totalorder %v607_v15, %v1854_v12 }
 0x18a   : >> { %vm1402_vm13 = vmpackc.low %vm658_vm10, %vm656_vm9 }
 0x18b   : >> { %1383 = vmatpush1.bf16.msk.msra.mxu0 %vm1382_vm15, %v1654_v38  ;;  %vm653_vm15 = vcmp.eq.s32.totalorder %v604_v62, %v1856_v13 }
 0x18c   : >> { %1385 = vmatprep.subr.msk.bf16.mxu0 %vm1384_vm0, %v1654_v38  ;;  %vm655_vm0 = vcmp.eq.s32.totalorder %v605_v63, %v1856_v13 }
 0x18d   : >> { %vm1396_vm2 = vmpackc.low %vm655_vm0, %vm653_vm15  ;;  %vm660_vm15 = vcmp.eq.s32.totalorder %v608_v16, %v1854_v12  ;;  %vm662_vm0 = vcmp.eq.s32.totalorder %v609_v19, %v1854_v12 }
 0x18e   : >> { %vm1406_vm3 = vmpackc.low %vm662_vm0, %vm660_vm15 }
 0x18f   : >> { %1387 = vmatpush1.bf16.msk.msra.mxu0 %vm1386_vm5, %v1654_v38  ;;  %vm657_vm5 = vcmp.eq.s32.totalorder %v606_v9, %v1856_v13 }
 0x190   : >> { %1389 = vmatprep.subr.msk.bf16.mxu0 %vm1388_vm6, %v1654_v38  ;;  %vm659_vm6 = vcmp.eq.s32.totalorder %v607_v15, %v1856_v13 }
 0x191   : >> { %vm1400_vm8 = vmpackc.low %vm659_vm6, %vm657_vm5  ;;  %vm664_vm5 = vcmp.eq.s32.totalorder %v610_v20, %v1854_v12  ;;  %vm666_vm6 = vcmp.eq.s32.totalorder %v611_v11, %v1854_v12 }
 0x192   : >> { %vm1410_vm9 = vmpackc.low %vm666_vm6, %vm664_vm5 }
 0x193   : >> { %1391 = vmatpush1.bf16.msk.msra.mxu0 %vm1390_vm11, %v1654_v38  ;;  %vm661_vm11 = vcmp.eq.s32.totalorder %v608_v16, %v1856_v13 }
 0x194   : >> { %1393 = vmatprep.subr.msk.bf16.mxu0 %vm1392_vm12, %v1654_v38  ;;  %vm663_vm12 = vcmp.eq.s32.totalorder %v609_v19, %v1856_v13 }
 0x195   : >> { %vm1404_vm14 = vmpackc.low %vm663_vm12, %vm661_vm11  ;;  %vm668_vm11 = vcmp.eq.s32.totalorder %v612_v24, %v1854_v12  ;;  %vm670_vm12 = vcmp.eq.s32.totalorder %v613_v25, %v1854_v12 }
 0x196   : >> { %vm1414_vm15 = vmpackc.low %vm670_vm12, %vm668_vm11 }
 0x197   : >> { %1395 = vmatpush1.bf16.msk.msra.mxu0 %vm1394_vm1, %v1654_v38  ;;  %vm665_vm1 = vcmp.eq.s32.totalorder %v610_v20, %v1856_v13 }
 0x198   : >> { %1397 = vmatprep.subr.msk.bf16.mxu0 %vm1396_vm2, %v1654_v38  ;;  %vm667_vm2 = vcmp.eq.s32.totalorder %v611_v11, %v1856_v13 }
 0x199   : >> { %vm1408_vm4 = vmpackc.low %vm667_vm2, %vm665_vm1  ;;  %vm672_vm1 = vcmp.eq.s32.totalorder %v614_v28, %v1854_v12  ;;  %vm674_vm2 = vcmp.eq.s32.totalorder %v615_v29, %v1854_v12 }
 0x19a   : >> { %vm1418_vm5 = vmpackc.low %vm674_vm2, %vm672_vm1 }
 0x19b   : >> { %1399 = vmatpush1.bf16.msk.msra.mxu0 %vm1398_vm7, %v1654_v38  ;;  %vm669_vm7 = vcmp.eq.s32.totalorder %v612_v24, %v1856_v13 }
 0x19c   : >> { %1401 = vmatprep.subr.msk.bf16.mxu0 %vm1400_vm8, %v1654_v38  ;;  %vm671_vm8 = vcmp.eq.s32.totalorder %v613_v25, %v1856_v13 }
 0x19d   : >> { %vm1412_vm10 = vmpackc.low %vm671_vm8, %vm669_vm7  ;;  %vm676_vm7 = vcmp.eq.s32.totalorder %v616_v32, %v1854_v12  ;;  %vm678_vm8 = vcmp.eq.s32.totalorder %v617_v33, %v1854_v12 }
 0x19e   : >> { %vm1422_vm11 = vmpackc.low %vm678_vm8, %vm676_vm7 }
 0x19f   : >> { %1403 = vmatpush1.bf16.msk.msra.mxu0 %vm1402_vm13, %v1654_v38  ;;  %vm673_vm13 = vcmp.eq.s32.totalorder %v614_v28, %v1856_v13 }
 0x1a0   : >> { %1405 = vmatprep.subr.msk.bf16.mxu0 %vm1404_vm14, %v1654_v38  ;;  %vm675_vm14 = vcmp.eq.s32.totalorder %v615_v29, %v1856_v13 }
 0x1a1   : >> { %vm1416_vm0 = vmpackc.low %vm675_vm14, %vm673_vm13  ;;  %vm680_vm13 = vcmp.eq.s32.totalorder %v618_v34, %v1854_v12  ;;  %vm682_vm14 = vcmp.eq.s32.totalorder %v619_v35, %v1854_v12 }
 0x1a3   : >> { %1407 = vmatpush1.bf16.msk.msra.mxu0 %vm1406_vm3, %v1654_v38  ;;  %vm677_vm3 = vcmp.eq.s32.totalorder %v616_v32, %v1856_v13 }
 0x1a4   : >> { %1409 = vmatprep.subr.msk.bf16.mxu0 %vm1408_vm4, %v1654_v38  ;;  %vm679_vm4 = vcmp.eq.s32.totalorder %v617_v33, %v1856_v13 }
 0x1a5   : >> { %vm1420_vm6 = vmpackc.low %vm679_vm4, %vm677_vm3 }
 0x1a7   : >> { %1411 = vmatpush1.bf16.msk.msra.mxu0 %vm1410_vm9, %v1654_v38  ;;  %vm681_vm9 = vcmp.eq.s32.totalorder %v618_v34, %v1856_v13 }
 0x1a8   : >> { %1413 = vmatprep.subr.msk.bf16.mxu0 %vm1412_vm10, %v1654_v38  ;;  %vm683_vm10 = vcmp.eq.s32.totalorder %v619_v35, %v1856_v13 }
 0x1a9   : >> { %vm1424_vm12 = vmpackc.low %vm683_vm10, %vm681_vm9 }
 0x1ab   : >> { %1415 = vmatpush1.bf16.msk.msra.mxu0 %vm1414_vm15, %v1654_v38  ;;  %vm1426_vm15 = vmpackc.low %vm682_vm14, %vm680_vm13 }
 0x1ac   : >> { %1417 = vmatprep.subr.msk.bf16.mxu0 %vm1416_vm0, %v1654_v38 }
 0x1af   : >> { %1419 = vmatpush1.bf16.msk.msra.mxu0 %vm1418_vm5, %v1654_v38 }
 0x1b0   : >> { %1421 = vmatprep.subr.msk.bf16.mxu0 %vm1420_vm6, %v1654_v38 }
 0x1b3   : >> { %1423 = vmatpush1.bf16.msk.msra.mxu0 %vm1422_vm11, %v1654_v38 }
 0x1b4   : >> { %1425 = vmatprep.subr.msk.bf16.mxu0 %vm1424_vm12, %v1654_v38 }
 0x1b7   : >> { %1427 = vmatpush1.bf16.msk.msra.mxu0 %vm1426_vm15, %v1654_v38 }
 0x1ba   : >> { %880 = vmatmul.mubr.f32.vlgmr.msra.gmra.mrb[0].mxu0 %v2190_v57 }
 0x28d   : >> { %v881_v23 = vpop.f32.mrb[0].mxu0  ;;  %579 = sbr.rel (!%p576_p5) target bundleno = 371 (0x173), region = 85 }
 0x28e   : >> { %v883_v44 = vpop.f32.mrb[1].mxu0 }
 0x28f   : >> { %v888_v45 = vcombine.low %v881_v23, %v883_v44 }
 0x291   : >> { %v890_v46 = vadd.f32 %v888_v45, %v581_v39 }
 0x293   : >> { %891 = vst [vmem:[#allocation2] sm:$0xff] %v890_v46 }
 0x294 PF: > { %s1299_s14 = sshll.u32 %s1636_s5, 7  ;;  %s911_s13 = sshll.u32 %s2106_s19, 4  ;;  %s912_s13 = int_to_ptr.vmem [resolvable:$true] %s911_s13 }
 0x295   : > { %s2296_s9 = scalar_lea.hbm %s2343_s4, %s1299_s14  ;;  %s895_s18 = scalar_lea.sflag [#allocation8], %s1807_s21 }
 0x296   : > { %s1556_s24 = scalar_lea.vmem %s912_s13, 128  ;;  %p2353_p1 = scmp.ne.s32.totalorder %s2348_s15, 0 }
 0x297   : > { %p1557_p8 = scmp.ne.s32.totalorder %s912_s13, %s1556_s24  ;;  %s1655_s26 = smov [#allocation9]  }
 0x298   : > { %s1560_s23 = sshll.u32 %s1655_s26, 4  ;;  %s1561_s23 = int_to_ptr.vmem [resolvable:$false] %s1560_s23 }
 0x299   : > { %p1558_p7 = pnand %p1557_p8, %p2353_p1  ;;  %s1562_s11 = scalar_lea.vmem %s1561_s23, 256 }
 0x29a   : > { %v892_v49 = vld [vmem:[#allocation2] sm:$0xff]  ;;  %p1563_p0 = scmp.lt.s32.totalorder %s912_s13, %s1561_s23  ;;  %p1564_p12 = scmp.lt.s32.totalorder %s1562_s11, %s1556_s24 }
 0x29b   : > { %893 = vst [vmem:[%s2106_s19] sm:$0xff] %v892_v49  ;;  %p1559_p11 = pneg %p1558_p7 }
 0x29c   : > { %p1565_p4 = por %p1564_p12, %p1563_p0 }
 0x29e   : > { %p1566_p6 = pnand %p1565_p4, %p1559_p11 }
 0x2a0   : > { %1569 = shalt.err (!%p1566_p6)
}
 0x2a1   : > { %s1570_s5 = scalar_lea.hbm %s2296_s9, 128  ;;  %s1574_s19 = scalar_lea.hbm %s2343_s4, 256 }
 0x2a2   : > { %p1571_p9 = scmp.ne.s32.totalorder %s2296_s9, %s1570_s5  ;;  %p1575_p3 = scmp.lt.u32.totalorder %s2296_s9, %s2343_s4 }
 0x2a3   : > { %p1576_p2 = scmp.lt.u32.totalorder %s1574_s19, %s1570_s5  ;;  %p1578_p8 = scmp.lt.u32.totalorder %s1570_s5, %s2296_s9 }
 0x2a4   : > { %p1572_p10 = pnand %p1571_p9, %p2353_p1 }
 0x2a5   : > { %p1577_p5 = por %p1576_p2, %p1575_p3 }
 0x2a6   : > { %p1573_p13 = pneg %p1572_p10 }
 0x2a7   : > { %p1579_p7 = por %p1578_p8, %p1577_p5 }
 0x2a9   : > { %p1580_p11 = pnand %p1579_p7, %p1573_p13 }
 0x2ab   : > { %1583 = shalt.err (!%p1580_p11)
}
 0x2ac   : > { %1430 = dma.vmem_to_hbm [thread:$0]  (%p2353_p1), %s912_s13, 128, %s2296_s9, %s895_s18  }
 0x2ad PF: > { %s923_s22 = sand.u32 1, %s1624_s0   ;;  %p2354_p0 = scmp.ne.s32.totalorder %s2349_s17, 0 }
 0x2ae   : > { %p2355_p12 = scmp.ge.s32.totalorder %s1644_s7, 2  ;;  %s924_s27 = scalar_lea.sflag [#allocation8], %s923_s22 }
 0x2b0   : > { %p1437_p4 = pnand %p2355_p12, %p2354_p0 }
 0x2b2   : > { %1619 = dma.done.wait (!%p1437_p4), %s924_s27, 128  }
 0x2b3   : > { %1621 = vsyncadd (!%p1437_p4), %s924_s27, 4294967168  ;;  %s28_s7 = sadd.s32 1, %s1644_s7   ;;  %s2356_s0 = smov %s1628_s1 }
 0x2b4   : > { %p25_p6 = scmp.ge.s32.totalorder %s28_s7, 4   ;;  %s2357_s1 = smov %s1632_s30 }
 0x2b5   : > { %s2358_s30 = smov %s1752_s16  ;;  %s2359_s5 = smov %s1640_s6 }
 0x2b6   : > { %s2360_s6 = smov %s2362_s10  ;;  %27 = sbr.rel (!%p25_p6) target bundleno = 28 (0x1c), region = 96 }
 0x2bd   :  { %929 = vsyncpa [#allocation7], 1 }
 0x2be   :  { %931 = vsyncpa [#allocation7 + $0x1], 1 }
 0x2bf   :  { %932 = vsyncpa [#allocation8], 1 }
 0x2c0   :  { %934 = vsyncpa [#allocation8 + $0x1], 1 }

</bundles_post_ra>
